<compile_context>
chip_gen: v5e
topology: v5e:2x2
jax: 0.10.0
libtpu: 0.0.40
codegen_flags: <defaults>
</compile_context>

<pallas_src>
import functools
import math

import jax
import jax.numpy as jnp
from jax import lax
from jax.experimental import pallas as pl
from jax.experimental.pallas import tpu as pltpu


# ----------------------------------------------------------------------------
# Helpers.
# ----------------------------------------------------------------------------
def _vmem_limit():
    """Scoped-VMEM budget: ~3/4 of physical VMEM, derived from the actual chip
    (128 MiB on v5e/v6e, 64 MiB per TC on v7x) so v7x does not inherit a
    v6e-sized budget."""
    try:
        cap = getattr(pltpu.get_tpu_info(), "vmem_capacity_bytes", None)
        if cap:
            return int(cap) * 3 // 4
    except Exception:
        pass
    return 48 * 1024 * 1024


def _tile_dim(dim, target, align):
    """Largest multiple of `align` that divides `dim` and is <= `target`.

    Falls back to the full dim (a block equal to the array dim is always
    legal regardless of the (8, 128) divisibility rule)."""
    if dim <= target:
        return dim
    t = (target // align) * align
    while t >= align:
        if dim % t == 0:
            return t
        t -= align
    return dim


def _sublane_align(dtype):
    return 8 if jnp.dtype(dtype).itemsize >= 4 else 16


# ----------------------------------------------------------------------------
# Tiled matmul (QKV projection and output projection).
# ----------------------------------------------------------------------------
def _matmul_fullk_kernel(a_ref, b_ref, o_ref):
    # Full-K blocks: one MXU contraction per grid step, no scratch round-trip.
    o_ref[...] = jnp.dot(a_ref[...], b_ref[...],
                         preferred_element_type=jnp.float32).astype(o_ref.dtype)


def _matmul_ksplit_kernel(a_ref, b_ref, o_ref, acc_ref):
    @pl.when(pl.program_id(2) == 0)
    def _():
        acc_ref[...] = jnp.zeros(acc_ref.shape, jnp.float32)

    acc_ref[...] += jnp.dot(a_ref[...], b_ref[...],
                            preferred_element_type=jnp.float32)

    @pl.when(pl.program_id(2) == pl.num_programs(2) - 1)
    def _():
        o_ref[...] = acc_ref[...].astype(o_ref.dtype)


def _matmul(a, b, *, tm=512, tn=512, tk=512, prefer_full_k=True):
    """a: (M, K) @ b: (K, N) -> (M, N) in a.dtype with f32 accumulation."""
    M, K = a.shape
    K2, N = b.shape
    assert K == K2, (a.shape, b.shape)
    isz = jnp.dtype(a.dtype).itemsize
    tm = _tile_dim(M, tm, _sublane_align(a.dtype))
    tn = _tile_dim(N, tn, 128)
    vmem = _vmem_limit()

    # Path 1: K fully resident per block (no reduction axis, no acc scratch).
    fullk_bytes = 2 * (tm * K + K * tn) * isz + 2 * tm * tn * isz
    if prefer_full_k and fullk_bytes <= vmem // 2:
        m_steps, n_steps = M // tm, N // tn
        # Stream whichever operand costs fewer repeated HBM reads; the other
        # operand's block index is constant along the inner grid axis so its
        # re-copy is elided (it is fetched exactly once).
        stream_b = (K * N * isz) * m_steps <= (M * K * isz) * n_steps
        if stream_b:
            grid = (m_steps, n_steps)                       # i outer, j inner
            a_map = lambda i, j: (i, 0)
            b_map = lambda i, j: (0, j)
            o_map = lambda i, j: (i, j)
        else:
            grid = (n_steps, m_steps)                       # j outer, i inner
            a_map = lambda j, i: (i, 0)
            b_map = lambda j, i: (0, j)
            o_map = lambda j, i: (i, j)
        return pl.pallas_call(
            _matmul_fullk_kernel,
            out_shape=jax.ShapeDtypeStruct((M, N), a.dtype),
            grid_spec=pltpu.PrefetchScalarGridSpec(
                num_scalar_prefetch=0,
                grid=grid,
                in_specs=[pl.BlockSpec((tm, K), a_map),
                          pl.BlockSpec((K, tn), b_map)],
                out_specs=pl.BlockSpec((tm, tn), o_map),
            ),
            compiler_params=pltpu.CompilerParams(
                dimension_semantics=("parallel", "parallel"),
                vmem_limit_bytes=vmem,
            ),
        )(a, b)

    # Path 2: K-reduction grid axis with an f32 VMEM accumulator.
    tk = _tile_dim(K, tk, 128)
    grid = (M // tm, N // tn, K // tk)
    return pl.pallas_call(
        _matmul_ksplit_kernel,
        out_shape=jax.ShapeDtypeStruct((M, N), a.dtype),
        grid_spec=pltpu.PrefetchScalarGridSpec(
            num_scalar_prefetch=0,
            grid=grid,
            in_specs=[pl.BlockSpec((tm, tk), lambda i, j, k: (i, k)),
                      pl.BlockSpec((tk, tn), lambda i, j, k: (k, j))],
            out_specs=pl.BlockSpec((tm, tn), lambda i, j, k: (i, j)),
            scratch_shapes=[pltpu.VMEM((tm, tn), jnp.float32)],
        ),
        compiler_params=pltpu.CompilerParams(
            dimension_semantics=("parallel", "parallel", "arbitrary"),
            vmem_limit_bytes=vmem,
        ),
    )(a, b)


# ----------------------------------------------------------------------------
# Flash-style attention (online softmax over KV tiles).
# ----------------------------------------------------------------------------
def _flash_kernel(q_ref, k_ref, v_ref, o_ref, m_ref, l_ref, acc_ref, *, scale):
    kv = pl.program_id(3)

    @pl.when(kv == 0)
    def _():
        m_ref[...] = jnp.full(m_ref.shape, -jnp.inf, jnp.float32)
        l_ref[...] = jnp.zeros(l_ref.shape, jnp.float32)
        acc_ref[...] = jnp.zeros(acc_ref.shape, jnp.float32)

    # Fold the softmax scale into the (tq, hd) q tile: tq*hd VPU multiplies per
    # KV step instead of tq*tk on the score matrix.
    q = q_ref[...] * scale                # (tq, hd), input dtype
    k = k_ref[...]                        # (tk, hd)
    v = v_ref[...]                        # (tk, hd)

    # scores = q @ k.T with f32 accumulation on the MXU.
    s = lax.dot_general(q, k, (((1,), (1,)), ((), ())),
                        preferred_element_type=jnp.float32)

    m_prev = m_ref[...]                                           # (tq, 1)
    m_new = jnp.maximum(m_prev, jnp.max(s, axis=-1, keepdims=True))
    alpha = jnp.exp(m_prev - m_new)                               # rescale old
    p = jnp.exp(s - m_new)                                        # (tq, tk) f32

    l_ref[...] = alpha * l_ref[...] + jnp.sum(p, axis=-1, keepdims=True)
    acc_ref[...] = alpha * acc_ref[...] + jnp.dot(
        p.astype(v.dtype), v, preferred_element_type=jnp.float32)
    m_ref[...] = m_new

    @pl.when(kv == pl.num_programs(3) - 1)
    def _():
        # Deferred normalization: one reciprocal per query row (finalize only,
        # off the critical MXU path), multiplied into the (tq, hd) accumulator.
        o_ref[...] = (acc_ref[...] * pl.reciprocal(l_ref[...], approx=False)
                      ).astype(o_ref.dtype)


def _flash_attention(qkv, *, n_heads, scale, block_q, block_k):
    """qkv: (B, T, 3H, 1, hd) with the 3H axis laid out (three, head).

    q/k/v blocks are read straight from the QKV projection output (no
    transposed copy) and the result is written in (B, T, H, 1, hd) layout so
    the reshape to (B*T, D) before the output projection is a free view.
    The trailing dummy unit axis keeps the blocks' last two dims equal to the
    full array dims (trivially satisfying the (8, 128) tiling rule) while the
    index_map picks the (three, head) slice."""
    B, T, threeH, _one, hd = qkv.shape
    H = n_heads
    assert threeH == 3 * H and _one == 1, qkv.shape

    align = _sublane_align(qkv.dtype)
    if T % align:
        raise NotImplementedError("TODO(synk): pad/mask ragged sequence lengths")
    block_q = _tile_dim(T, block_q, align)
    block_k = _tile_dim(T, block_k, align)

    grid = (B, H, T // block_q, T // block_k)

    def q_map(b, h, i, j):
        return (b, i, h, 0, 0)

    def k_map(b, h, i, j):
        return (b, j, H + h, 0, 0)

    def v_map(b, h, i, j):
        return (b, j, 2 * H + h, 0, 0)

    def o_map(b, h, i, j):
        return (b, i, h, 0, 0)

    q_spec = pl.BlockSpec(
        (pl.Squeezed(), block_q, pl.Squeezed(), pl.Squeezed(), hd), q_map)
    k_spec = pl.BlockSpec(
        (pl.Squeezed(), block_k, pl.Squeezed(), pl.Squeezed(), hd), k_map)
    v_spec = pl.BlockSpec(
        (pl.Squeezed(), block_k, pl.Squeezed(), pl.Squeezed(), hd), v_map)
    o_spec = pl.BlockSpec(
        (pl.Squeezed(), block_q, pl.Squeezed(), pl.Squeezed(), hd), o_map)

    kernel = functools.partial(_flash_kernel, scale=scale)
    return pl.pallas_call(
        kernel,
        out_shape=jax.ShapeDtypeStruct((B, T, H, 1, hd), qkv.dtype),
        grid_spec=pltpu.PrefetchScalarGridSpec(
            num_scalar_prefetch=0,
            grid=grid,
            in_specs=[q_spec, k_spec, v_spec],
            out_specs=o_spec,
            scratch_shapes=[
                pltpu.VMEM((block_q, 1), jnp.float32),   # running row max
                pltpu.VMEM((block_q, 1), jnp.float32),   # running row sum
                pltpu.VMEM((block_q, hd), jnp.float32),  # un-normalized acc
            ],
        ),
        compiler_params=pltpu.CompilerParams(
            # Leading 'parallel' axes (B, H, q-tile) shard across the 2 TCs on
            # v7x; the KV axis is the online-softmax reduction -> 'arbitrary'.
            dimension_semantics=("parallel", "parallel", "parallel",
                                 "arbitrary"),
            vmem_limit_bytes=_vmem_limit(),
        ),
    )(qkv, qkv, qkv)


# ----------------------------------------------------------------------------
# Full MHA forward.
# ----------------------------------------------------------------------------
def prepare_mha_weights(wqkv, wout, dtype=None):
    """One-time, init-side layout plumbing: transpose the PyTorch nn.Linear
    (out_features, in_features) weights to (in, out) so every kernel matmul is
    a canonical (M,K)x(K,N) contraction, and optionally cast the compute dtype
    (e.g. bf16 for the MXU). Doing this per forward call would be a wasted
    HBM pass."""
    wqkv_t = jnp.transpose(wqkv)
    wout_t = jnp.transpose(wout)
    if dtype is not None:
        wqkv_t = wqkv_t.astype(dtype)
        wout_t = wout_t.astype(dtype)
    return wqkv_t, wout_t


def mha_forward(x, wqkv_t, wout_t, *, n_heads,
                block_q=512, block_k=128, mm_tm=512, mm_tn=512, mm_tk=512):
    """Pallas MHA forward (n_heads == n_kv_heads, eval, no rotary/causal/cache).

    x: (B, T, D); wqkv_t: (D, 3D), wout_t: (D, D) already in (in, out) layout
    and in the activation dtype (see prepare_mha_weights)."""
    B, T, D = x.shape
    H = n_heads
    hd = D // H
    scale = 1.0 / math.sqrt(hd)
    assert wqkv_t.shape == (D, 3 * D), wqkv_t.shape
    assert wout_t.shape == (D, D), wout_t.shape
    if wqkv_t.dtype != x.dtype or wout_t.dtype != x.dtype:
        raise ValueError(
            "weights must be pre-cast to the activation dtype at init via "
            "prepare_mha_weights(..., dtype=x.dtype); casting per call would "
            "re-stream the weights through HBM.")

    # 1) QKV projection (tiled matmul, f32 accumulation).
    qkv = _matmul(x.reshape(B * T, D), wqkv_t, tm=mm_tm, tn=mm_tn, tk=mm_tk)

    # 2) 'B T (three h d)' split is a free view: the flash BlockSpecs index the
    #    (three, head) slice directly, so no transposed qkv copy is written.
    qkv = qkv.reshape(B, T, 3 * H, 1, hd)

    # 3) Flash attention over a (batch, head, q-tile, kv-tile) grid.
    attn = _flash_attention(qkv, n_heads=H, scale=scale,
                            block_q=block_q, block_k=block_k)

    # 4) Output already lands in (B, T, H, 1, hd): 'B h T d -> B T (h d)' is a
    #    free reshape; then the output projection.
    out = _matmul(attn.reshape(B * T, D), wout_t, tm=mm_tm, tn=mm_tn, tk=mm_tk)
    return out.reshape(B, T, D)


def mha_reference(x, wqkv, wout, *, n_heads):
    """Pure-JAX reference matching the PyTorch forward (eval, no rotary)."""
    B, T, D = x.shape
    head_dim = D // n_heads
    scale = 1.0 / math.sqrt(head_dim)

    qkv = jnp.einsum("btd,od->bto", x, wqkv)                 # (B, T, 3D)
    qkv = qkv.reshape(B, T, 3, n_heads, head_dim)            # 'B T (three h d)'
    qkv = jnp.transpose(qkv, (0, 2, 3, 1, 4))                # 'B three h T d'
    q, k, v = qkv[:, 0], qkv[:, 1], qkv[:, 2]                # (B, h, T, d)

    s = jnp.einsum("bhtd,bhsd->bhts", q, k) * scale
    p = jax.nn.softmax(s, axis=-1)
    out = jnp.einsum("bhts,bhsd->bhtd", p, v)                # (B, h, T, d)
    out = jnp.transpose(out, (0, 2, 1, 3)).reshape(B, T, D)  # -> 'B T (h d)'
    return jnp.einsum("btd,od->bto", out, wout)


if __name__ == "__main__":
    # Small, module-consistent shapes; flash blocks chosen so the online
    # softmax iterates over several q- and kv-tiles.
    B, T = 2, 64
    dim = 64
    n_heads = 4
    n_kv_heads = 4                                    # n_heads == n_kv_heads
    head_dim = dim // n_heads
    qkv_dim = (n_heads + 2 * n_kv_heads) * head_dim   # = 3 * dim = 192

    key = jax.random.PRNGKey(0)
    kx, kq, ko = jax.random.split(key, 3)

    x = jax.random.normal(kx, (B, T, dim), dtype=jnp.float32)
    bound = 1.0 / math.sqrt(dim)                      # nn.Linear-style init
    wqkv = jax.random.uniform(kq, (qkv_dim, dim), jnp.float32, -bound, bound)
    wout = jax.random.uniform(ko, (dim, dim), jnp.float32, -bound, bound)

    ref = mha_reference(x, wqkv, wout, n_heads=n_heads)

    # f32 path (weights transposed once, at "init").
    wqkv_t, wout_t = prepare_mha_weights(wqkv, wout)
    out = mha_forward(x, wqkv_t, wout_t, n_heads=n_heads, block_q=32, block_k=16)
    out = jax.block_until_ready(out)
    assert out.shape == (B, T, dim), out.shape
    max_err = float(jnp.max(jnp.abs(out - ref)))
    assert max_err < 2e-2, max_err

    # bf16 MXU path: activations/weights cast once, softmax state stays f32.
    wqkv_tb, wout_tb = prepare_mha_weights(wqkv, wout, dtype=jnp.bfloat16)
    out_bf16 = mha_forward(x.astype(jnp.bfloat16), wqkv_tb, wout_tb,
                           n_heads=n_heads, block_q=32, block_k=16)
    out_bf16 = jax.block_until_ready(out_bf16)
    max_err_bf16 = float(jnp.max(jnp.abs(out_bf16.astype(jnp.float32) - ref)))
    assert max_err_bf16 < 1.5e-1, max_err_bf16

    # Exercise both projection-matmul pipelines (full-K resident and K-split).
    a = jax.random.normal(kq, (128, 256), jnp.float32)
    b = jax.random.normal(ko, (256, 384), jnp.float32)
    y0 = jnp.dot(a, b)
    y1 = jax.block_until_ready(_matmul(a, b))
    y2 = jax.block_until_ready(_matmul(a, b, prefer_full_k=False, tk=128))
    denom = float(jnp.max(jnp.abs(y0)))
    assert float(jnp.max(jnp.abs(y1 - y0))) / denom < 1e-2
    assert float(jnp.max(jnp.abs(y2 - y0))) / denom < 1e-2

    print("KERNEL_OK")
</pallas_src>

<mosaic_0001>
module attributes {stable_mosaic.version = 11 : i64} {
  func.func @_matmul_fullk_kernel(%arg0: i32, %arg1: i32, %arg2: memref<128x64xf32, #tpu.memory_space<vmem>>, %arg3: memref<64x192xf32, #tpu.memory_space<vmem>>, %arg4: memref<128x192xf32, #tpu.memory_space<vmem>>) attributes {dimension_semantics = [#tpu.dimension_semantics<parallel>, #tpu.dimension_semantics<parallel>], iteration_bounds = array<i64: 1, 1>, scalar_prefetch = 0 : i64, scratch_operands = 0 : i64, tpu.core_type = #tpu.core_type<tc>, window_params = [{transform_indices = @transform_0, window_bounds = array<i64: 128, 64>}, {transform_indices = @transform_1, window_bounds = array<i64: 64, 192>}, {transform_indices = @transform_2, window_bounds = array<i64: 128, 192>}]} {
    %c0 = arith.constant 0 : index
    %c0_0 = arith.constant 0 : index
    %0 = vector.load %arg2[%c0, %c0_0] : memref<128x64xf32, #tpu.memory_space<vmem>>, vector<128x64xf32>
    %c0_1 = arith.constant 0 : index
    %c0_2 = arith.constant 0 : index
    %1 = vector.load %arg3[%c0_1, %c0_2] : memref<64x192xf32, #tpu.memory_space<vmem>>, vector<64x192xf32>
    %cst = arith.constant dense<0.000000e+00> : vector<128x192xf32>
    %2 = tpu.matmul %0, %1, %cst {dimension_numbers = #tpu.dot_dimension_numbers<[1], [0], [0], [1], [0, 0, 1, 1], [], []>} : vector<128x64xf32>, vector<64x192xf32>, vector<128x192xf32> -> vector<128x192xf32>
    %c0_3 = arith.constant 0 : index
    %c0_4 = arith.constant 0 : index
    %3 = vector.load %arg4[%c0_3, %c0_4] : memref<128x192xf32, #tpu.memory_space<vmem>>, vector<128x192xf32>
    tpu.vector_store %arg4[%c0_3, %c0_4], %2 {strides = array<i32>} : memref<128x192xf32, #tpu.memory_space<vmem>>, vector<128x192xf32>,
    return
  }
  func.func @transform_0(%arg0: i32, %arg1: i32) -> (i32, i32) {
    %c0_i32 = arith.constant 0 : i32
    %c0_i32_0 = arith.constant 0 : i32
    return %arg1, %c0_i32 : i32, i32
  }
  func.func @transform_1(%arg0: i32, %arg1: i32) -> (i32, i32) {
    %c0_i32 = arith.constant 0 : i32
    %c0_i32_0 = arith.constant 0 : i32
    return %c0_i32, %arg0 : i32, i32
  }
  func.func @transform_2(%arg0: i32, %arg1: i32) -> (i32, i32) {
    %c0_i32 = arith.constant 0 : i32
    return %arg1, %arg0 : i32, i32
  }
}

</mosaic_0001>

<bundles_post_ra>
// kernel: tpu_custom_call.1
= control target key start
LH: loop header
LB: loop body
LE: loop exit
PB: predicated region body
PF: predicated region fallthrough
CT: control target
= control target key end

     0   :  { %vm43_vm0 = vcmask 523264   ;;  %s561_s1 = inlined_call_operand.vmem [shape: f32[64,192], index: 1, kind: input, shape index: {}]   ;;  %s562_s0 = inlined_call_operand.vmem [shape: f32[128,64], index: 0, kind: input, shape index: {}]   ;;  %s563_s2 = inlined_call_operand.vmem [shape: f32[128,192], index: 2, kind: output, shape index: {}]  }
   0x1   :  { %v41_v0 = vld [vmem:[%s561_s1 + $0x70] sm:$0xff]  ;;  %v42_v1 = vld [vmem:[%s561_s1 + $0x78] sm:$0xff]  ;;  %v39_v2 = vld [vmem:[%s561_s1 + $0x60] sm:$0xff] }
   0x2   :  { %290 = vmatpush.msra.mxu2 %v41_v0  ;;  %298 = vmatpush.msra.mxu3 %v42_v1  ;;  %v40_v3 = vld [vmem:[%s561_s1 + $0x68] sm:$0xff]  ;;  %v37_v4 = vld [vmem:[%s561_s1 + $0x50] sm:$0xff]  ;;  %v38_v5 = vld [vmem:[%s561_s1 + $0x58] sm:$0xff] }
   0x3   :  { %100 = vmatpush.msra.mxu0 %v41_v0  ;;  %165 = vmatpush.msra.mxu1 %v42_v1  ;;  %v35_v6 = vld [vmem:[%s561_s1 + $0x40] sm:$0xff]  ;;  %v36_v7 = vld [vmem:[%s561_s1 + $0x48] sm:$0xff]  ;;  %v33_v8 = vld [vmem:[%s561_s1 + $0x30] sm:$0xff] }
   0x4   :  { %291 = vmatpush.msra.mxu2 %v39_v2  ;;  %299 = vmatpush.msra.mxu3 %v40_v3  ;;  %v34_v9 = vld [vmem:[%s561_s1 + $0x38] sm:$0xff]  ;;  %v31_v10 = vld [vmem:[%s561_s1 + $0x20] sm:$0xff]  ;;  %v32_v11 = vld [vmem:[%s561_s1 + $0x28] sm:$0xff] }
   0x5   :  { %101 = vmatpush.msra.mxu0 %v39_v2  ;;  %166 = vmatpush.msra.mxu1 %v40_v3  ;;  %v29_v12 = vld [vmem:[%s561_s1 + $0x10] sm:$0xff]  ;;  %v30_v13 = vld [vmem:[%s561_s1 + $0x18] sm:$0xff]  ;;  %v27_v14 = vld [vmem:[%s561_s1] sm:$0xff] }
   0x6   :  { %292 = vmatpush.msra.mxu2 %v37_v4  ;;  %300 = vmatpush.msra.mxu3 %v38_v5  ;;  %v28_v15 = vld [vmem:[%s561_s1 + $0x8] sm:$0xff]  ;;  %v19_v16 = vld [vmem:[%s562_s0 + $0x40] sm:$0xff]  ;;  %v21_v20 = vld [vmem:[%s562_s0 + $0x50] sm:$0xff] }
   0x7   :  { %102 = vmatpush.msra.mxu0 %v37_v4  ;;  %167 = vmatpush.msra.mxu1 %v38_v5  ;;  %v11_v17 = vld [vmem:[%s562_s0] sm:$0xff]  ;;  %v20_v18 = vld [vmem:[%s562_s0 + $0x48] sm:$0xff]  ;;  %v13_v21 = vld [vmem:[%s562_s0 + $0x10] sm:$0xff] }
   0x8   :  { %293 = vmatpush.msra.mxu2 %v35_v6  ;;  %301 = vmatpush.msra.mxu3 %v36_v7  ;;  %v12_v19 = vld [vmem:[%s562_s0 + $0x8] sm:$0xff]  ;;  %v22_v22 = vld [vmem:[%s562_s0 + $0x58] sm:$0xff]  ;;  %v23_v24 = vld [vmem:[%s562_s0 + $0x60] sm:$0xff] }
   0x9   :  { %103 = vmatpush.msra.mxu0 %v35_v6  ;;  %168 = vmatpush.msra.mxu1 %v36_v7  ;;  %v14_v23 = vld [vmem:[%s562_s0 + $0x18] sm:$0xff]  ;;  %v15_v25 = vld [vmem:[%s562_s0 + $0x20] sm:$0xff]  ;;  %v24_v26 = vld [vmem:[%s562_s0 + $0x68] sm:$0xff] }
   0xa   :  { %294 = vmatpush.msra.mxu2 %v33_v8  ;;  %302 = vmatpush.msra.mxu3 %v34_v9  ;;  %v16_v27 = vld [vmem:[%s562_s0 + $0x28] sm:$0xff]  ;;  %v25_v28 = vld [vmem:[%s562_s0 + $0x70] sm:$0xff]  ;;  %v26_v30 = vld [vmem:[%s562_s0 + $0x78] sm:$0xff] }
   0xb   :  { %104 = vmatpush.msra.mxu0 %v33_v8  ;;  %169 = vmatpush.msra.mxu1 %v34_v9  ;;  %v17_v29 = vld [vmem:[%s562_s0 + $0x30] sm:$0xff]  ;;  %v18_v31 = vld [vmem:[%s562_s0 + $0x38] sm:$0xff] }
   0xc   :  { %295 = vmatpush.msra.mxu2 %v31_v10  ;;  %303 = vmatpush.msra.mxu3 %v32_v11 }
   0xd   :  { %105 = vmatpush.msra.mxu0 %v31_v10  ;;  %170 = vmatpush.msra.mxu1 %v32_v11 }
   0xe   :  { %296 = vmatpush.msra.mxu2 %v29_v12  ;;  %304 = vmatpush.msra.mxu3 %v30_v13 }
   0xf   :  { %106 = vmatpush.msra.mxu0 %v29_v12  ;;  %171 = vmatpush.msra.mxu1 %v30_v13 }
  0x10   :  { %297 = vmatpush.msra.mxu2 %v27_v14  ;;  %305 = vmatpush.msra.mxu3 %v28_v15 }
  0x11   :  { %266 = vmatmul.msk.f32.vlgmr.msra.gmra.mxu2 %vm43_vm0, %v19_v16  ;;  %282 = vmatmul.msk.f32.vlgmr.msra.gmra.mxu3 %vm43_vm0, %v19_v16 }
  0x12   :  { %107 = vmatpush.msra.mxu0 %v27_v14  ;;  %172 = vmatpush.msra.mxu1 %v28_v15 }
  0x13   :  { %258 = vmatmul.msk.f32.vlgmr.msra.gmra.mxu0 %vm43_vm0, %v11_v17  ;;  %274 = vmatmul.msk.f32.vlgmr.msra.gmra.mxu1 %vm43_vm0, %v11_v17 }
  0x19   :  { %267 = vmatmul.msk.f32.gmra.mxu2 %vm43_vm0, %v20_v18  ;;  %283 = vmatmul.msk.f32.gmra.mxu3 %vm43_vm0, %v20_v18 }
  0x1b   :  { %259 = vmatmul.msk.f32.gmra.mxu0 %vm43_vm0, %v12_v19  ;;  %275 = vmatmul.msk.f32.gmra.mxu1 %vm43_vm0, %v12_v19 }
  0x21   :  { %268 = vmatmul.msk.f32.gmra.mxu2 %vm43_vm0, %v21_v20  ;;  %284 = vmatmul.msk.f32.gmra.mxu3 %vm43_vm0, %v21_v20 }
  0x23   :  { %260 = vmatmul.msk.f32.gmra.mxu0 %vm43_vm0, %v13_v21  ;;  %276 = vmatmul.msk.f32.gmra.mxu1 %vm43_vm0, %v13_v21 }
  0x29   :  { %269 = vmatmul.msk.f32.gmra.mxu2 %vm43_vm0, %v22_v22  ;;  %285 = vmatmul.msk.f32.gmra.mxu3 %vm43_vm0, %v22_v22 }
  0x2b   :  { %261 = vmatmul.msk.f32.gmra.mxu0 %vm43_vm0, %v14_v23  ;;  %277 = vmatmul.msk.f32.gmra.mxu1 %vm43_vm0, %v14_v23 }
  0x31   :  { %270 = vmatmul.msk.f32.gmra.mxu2 %vm43_vm0, %v23_v24  ;;  %286 = vmatmul.msk.f32.gmra.mxu3 %vm43_vm0, %v23_v24 }
  0x33   :  { %262 = vmatmul.msk.f32.gmra.mxu0 %vm43_vm0, %v15_v25  ;;  %278 = vmatmul.msk.f32.gmra.mxu1 %vm43_vm0, %v15_v25 }
  0x39   :  { %271 = vmatmul.msk.f32.gmra.mxu2 %vm43_vm0, %v24_v26  ;;  %287 = vmatmul.msk.f32.gmra.mxu3 %vm43_vm0, %v24_v26 }
  0x3b   :  { %263 = vmatmul.msk.f32.gmra.mxu0 %vm43_vm0, %v16_v27  ;;  %279 = vmatmul.msk.f32.gmra.mxu1 %vm43_vm0, %v16_v27 }
  0x41   :  { %272 = vmatmul.msk.f32.gmra.mxu2 %vm43_vm0, %v25_v28  ;;  %288 = vmatmul.msk.f32.gmra.mxu3 %vm43_vm0, %v25_v28 }
  0x43   :  { %264 = vmatmul.msk.f32.gmra.mxu0 %vm43_vm0, %v17_v29  ;;  %280 = vmatmul.msk.f32.gmra.mxu1 %vm43_vm0, %v17_v29 }
  0x49   :  { %273 = vmatmul.msk.f32.gmra.mxu2 %vm43_vm0, %v26_v30  ;;  %289 = vmatmul.msk.f32.gmra.mxu3 %vm43_vm0, %v26_v30 }
  0x4b   :  { %265 = vmatmul.msk.f32.gmra.mxu0 %vm43_vm0, %v18_v31  ;;  %281 = vmatmul.msk.f32.gmra.mxu1 %vm43_vm0, %v18_v31 }
  0x90   :  { %v109_v32 = vpop.f32.mrf.mxu0  ;;  %v174_v33 = vpop.f32.mrf.mxu1 }
  0x91   :  { %222 = vst [vmem:[%s563_s2] sm:$0xff] %v109_v32 }
  0x92   :  { %223 = vst.msk [vmem:[%s563_s2 + $0x8] sm:$0xff] %vm43_vm0, %v174_v33 }
  0x94   :  { %v133_v34 = vpop.f32.mrf.mxu2  ;;  %v198_v35 = vpop.f32.mrf.mxu3 }
  0x95   :  { %238 = vst [vmem:[%s563_s2 + $0x80] sm:$0xff] %v133_v34 }
  0x96   :  { %239 = vst.msk [vmem:[%s563_s2 + $0x88] sm:$0xff] %vm43_vm0, %v198_v35 }
  0x98   :  { %v112_v36 = vpop.f32.mrf.mxu0  ;;  %v177_v37 = vpop.f32.mrf.mxu1 }
  0x99   :  { %224 = vst [vmem:[%s563_s2 + $0x10] sm:$0xff] %v112_v36 }
  0x9a   :  { %225 = vst.msk [vmem:[%s563_s2 + $0x18] sm:$0xff] %vm43_vm0, %v177_v37 }
  0x9c   :  { %v136_v38 = vpop.f32.mrf.mxu2  ;;  %v201_v39 = vpop.f32.mrf.mxu3 }
  0x9d   :  { %240 = vst [vmem:[%s563_s2 + $0x90] sm:$0xff] %v136_v38 }
  0x9e   :  { %241 = vst.msk [vmem:[%s563_s2 + $0x98] sm:$0xff] %vm43_vm0, %v201_v39 }
  0xa0   :  { %v115_v40 = vpop.f32.mrf.mxu0  ;;  %v180_v41 = vpop.f32.mrf.mxu1 }
  0xa1   :  { %226 = vst [vmem:[%s563_s2 + $0x20] sm:$0xff] %v115_v40 }
  0xa2   :  { %227 = vst.msk [vmem:[%s563_s2 + $0x28] sm:$0xff] %vm43_vm0, %v180_v41 }
  0xa4   :  { %v139_v42 = vpop.f32.mrf.mxu2  ;;  %v204_v43 = vpop.f32.mrf.mxu3 }
  0xa5   :  { %242 = vst [vmem:[%s563_s2 + $0xa0] sm:$0xff] %v139_v42 }
  0xa6   :  { %243 = vst.msk [vmem:[%s563_s2 + $0xa8] sm:$0xff] %vm43_vm0, %v204_v43 }
  0xa8   :  { %v118_v44 = vpop.f32.mrf.mxu0  ;;  %v183_v45 = vpop.f32.mrf.mxu1 }
  0xa9   :  { %228 = vst [vmem:[%s563_s2 + $0x30] sm:$0xff] %v118_v44 }
  0xaa   :  { %229 = vst.msk [vmem:[%s563_s2 + $0x38] sm:$0xff] %vm43_vm0, %v183_v45 }
  0xac   :  { %v142_v46 = vpop.f32.mrf.mxu2  ;;  %v207_v47 = vpop.f32.mrf.mxu3 }
  0xad   :  { %244 = vst [vmem:[%s563_s2 + $0xb0] sm:$0xff] %v142_v46 }
  0xae   :  { %245 = vst.msk [vmem:[%s563_s2 + $0xb8] sm:$0xff] %vm43_vm0, %v207_v47 }
  0xb0   :  { %v121_v48 = vpop.f32.mrf.mxu0  ;;  %v186_v49 = vpop.f32.mrf.mxu1 }
  0xb1   :  { %230 = vst [vmem:[%s563_s2 + $0x40] sm:$0xff] %v121_v48 }
  0xb2   :  { %231 = vst.msk [vmem:[%s563_s2 + $0x48] sm:$0xff] %vm43_vm0, %v186_v49 }
  0xb4   :  { %v145_v50 = vpop.f32.mrf.mxu2  ;;  %v210_v51 = vpop.f32.mrf.mxu3 }
  0xb5   :  { %246 = vst [vmem:[%s563_s2 + $0xc0] sm:$0xff] %v145_v50 }
  0xb6   :  { %247 = vst.msk [vmem:[%s563_s2 + $0xc8] sm:$0xff] %vm43_vm0, %v210_v51 }
  0xb8   :  { %v124_v52 = vpop.f32.mrf.mxu0  ;;  %v189_v53 = vpop.f32.mrf.mxu1 }
  0xb9   :  { %232 = vst [vmem:[%s563_s2 + $0x50] sm:$0xff] %v124_v52 }
  0xba   :  { %233 = vst.msk [vmem:[%s563_s2 + $0x58] sm:$0xff] %vm43_vm0, %v189_v53 }
  0xbc   :  { %v148_v54 = vpop.f32.mrf.mxu2  ;;  %v213_v55 = vpop.f32.mrf.mxu3 }
  0xbd   :  { %248 = vst [vmem:[%s563_s2 + $0xd0] sm:$0xff] %v148_v54 }
  0xbe   :  { %249 = vst.msk [vmem:[%s563_s2 + $0xd8] sm:$0xff] %vm43_vm0, %v213_v55 }
  0xc0   :  { %v127_v56 = vpop.f32.mrf.mxu0  ;;  %v192_v57 = vpop.f32.mrf.mxu1 }
  0xc1   :  { %234 = vst [vmem:[%s563_s2 + $0x60] sm:$0xff] %v127_v56 }
  0xc2   :  { %235 = vst.msk [vmem:[%s563_s2 + $0x68] sm:$0xff] %vm43_vm0, %v192_v57 }
  0xc4   :  { %v151_v58 = vpop.f32.mrf.mxu2  ;;  %v216_v59 = vpop.f32.mrf.mxu3 }
  0xc5   :  { %250 = vst [vmem:[%s563_s2 + $0xe0] sm:$0xff] %v151_v58 }
  0xc6   :  { %251 = vst.msk [vmem:[%s563_s2 + $0xe8] sm:$0xff] %vm43_vm0, %v216_v59 }
  0xc8   :  { %v130_v60 = vpop.f32.mrf.mxu0  ;;  %v195_v61 = vpop.f32.mrf.mxu1 }
  0xc9   :  { %236 = vst [vmem:[%s563_s2 + $0x70] sm:$0xff] %v130_v60 }
  0xca   :  { %237 = vst.msk [vmem:[%s563_s2 + $0x78] sm:$0xff] %vm43_vm0, %v195_v61 }
  0xcc   :  { %v154_v62 = vpop.f32.mrf.mxu2  ;;  %v219_v63 = vpop.f32.mrf.mxu3 }
  0xcd   :  { %252 = vst [vmem:[%s563_s2 + $0xf0] sm:$0xff] %v154_v62 }
  0xce   :  { %253 = vst.msk [vmem:[%s563_s2 + $0xf8] sm:$0xff] %vm43_vm0, %v219_v63 }

</bundles_post_ra>
